<compile_context>
chip_gen: v7x
topology: tpu7x:2x2x1
jax: 0.10.0
libtpu: 0.0.40
codegen_flags: <defaults>
</compile_context>

<pallas_src>
import functools

import numpy as np

import jax
import jax.numpy as jnp
from jax.experimental import pallas as pl
from jax.experimental.pallas import tpu as pltpu


def _round_up(x, m):
    return ((x + m - 1) // m) * m


# --------------------------------------------------------------------------
# Kernel
# --------------------------------------------------------------------------
def _encoder_kernel(x_ref, w1_ref, b1_ref, w2_ref, b2_ref, out_ref, *,
                    split_lane, hidden, split_heads):
    """Fused two-head MLP.

    fused path  (2L <= 128): one block-diagonal [2H, 128] matmul; lanes
        [0, L) -> loc, [L, 2L) -> |scale|, rest zero padding.
    split path  (2L  > 128): two dense [H, Lpad] matmuls; lanes
        [0, Lpad) -> loc slab, [Lpad, 2*Lpad) -> |scale| slab.
    """
    # Layer 1 (both heads fused along lanes): f32 accumulation on the MXU.
    h = jnp.dot(x_ref[...], w1_ref[...], preferred_element_type=jnp.float32)
    h = jnp.maximum(h + b1_ref[...].astype(jnp.float32), 0.0)
    h = h.astype(w2_ref.dtype)

    b2 = b2_ref[...].astype(jnp.float32)

    if split_heads:
        lp = out_ref.shape[1] // 2
        w2 = w2_ref[...]
        y_loc = jnp.dot(h[:, :hidden], w2[:hidden, :],
                        preferred_element_type=jnp.float32) + b2[:, :lp]
        y_sc = jnp.dot(h[:, hidden:], w2[hidden:, :],
                       preferred_element_type=jnp.float32) + b2[:, lp:]
        out_ref[...] = jnp.concatenate(
            [y_loc, jnp.abs(y_sc)], axis=1).astype(out_ref.dtype)
    else:
        y = jnp.dot(h, w2_ref[...], preferred_element_type=jnp.float32) + b2
        col = jax.lax.broadcasted_iota(jnp.int32, y.shape, dimension=1)
        out_ref[...] = jnp.where(col >= split_lane, jnp.abs(y), y).astype(out_ref.dtype)


# --------------------------------------------------------------------------
# Parameter packing (fuses loc/scale heads into lane-dense buffers)
# --------------------------------------------------------------------------
def pack_encoder_params(raw, dtype=None):
    """raw: dict w1l,b1l,w2l,b2l,w1s,b1s,w2s,b2s (weights stored [in, out]).

    dtype: storage/compute dtype for the big weights (use jnp.bfloat16 on
    TPU for the memory-bound win; accumulation stays f32 in-kernel).
    Biases are kept f32 (tiny; preserves epilogue precision).
    """
    D, H = raw["w1l"].shape
    L = raw["w2l"].shape[1]
    dtype = dtype or raw["w1l"].dtype
    split_heads = (2 * L) > 128

    W1 = jnp.concatenate([raw["w1l"], raw["w1s"]], axis=1).astype(dtype)   # [D, 2H]
    B1 = jnp.concatenate([raw["b1l"], raw["b1s"]], axis=1).astype(jnp.float32)

    if split_heads:
        lp = _round_up(L, 128)
        out_pad = 2 * lp
        W2 = jnp.zeros((2 * H, lp), dtype)                                 # stacked
        W2 = W2.at[:H, :L].set(raw["w2l"].astype(dtype))
        W2 = W2.at[H:, :L].set(raw["w2s"].astype(dtype))
        B2 = jnp.zeros((1, out_pad), jnp.float32)
        B2 = B2.at[:, :L].set(raw["b2l"].astype(jnp.float32))
        B2 = B2.at[:, lp:lp + L].set(raw["b2s"].astype(jnp.float32))
    else:
        out_pad = 128
        W2 = jnp.zeros((2 * H, out_pad), dtype)                            # block-diag
        W2 = W2.at[:H, :L].set(raw["w2l"].astype(dtype))
        W2 = W2.at[H:, L:2 * L].set(raw["w2s"].astype(dtype))
        B2 = jnp.zeros((1, out_pad), jnp.float32)
        B2 = B2.at[:, :L].set(raw["b2l"].astype(jnp.float32))
        B2 = B2.at[:, L:2 * L].set(raw["b2s"].astype(jnp.float32))

    return {"W1": W1, "B1": B1, "W2": W2, "B2": B2,
            "L": L, "H": H, "out_pad": out_pad, "split_heads": split_heads}


# --------------------------------------------------------------------------
# Tiling / VMEM sizing helpers
# --------------------------------------------------------------------------
def _vmem_budget_bytes():
    # Conservative default that fits every generation's scoped VMEM.
    budget = 32 << 20
    try:  # use real capacity when the query is available (v7x has only 64 MiB)
        cap = pltpu.get_tpu_info().vmem_capacity_bytes
        budget = int(min(max(cap // 2, 16 << 20), 96 << 20))
    except Exception:
        pass
    return budget


def _choose_batch_tiling(B, max_tile_rows):
    """Pick (TB, B_pad).  Prefers: no wrapper jnp.pad beyond the 8-row sublane
    round-up, >=2 grid steps (v7x megacore), largest tile <= max_tile_rows."""
    b8 = _round_up(max(B, 8), 8)
    max_tb = max(8, (max_tile_rows // 8) * 8)
    if b8 <= max_tb:
        half = b8 // 2
        if half >= 8 and half % 8 == 0:
            return half, b8            # two grid steps, no extra padding
        return b8, b8                  # tiny batch: single tile
    # Largest multiple-of-8 tile <= max_tb that divides b8 exactly (no pad).
    tb = max_tb
    while tb >= 8 and b8 % tb:
        tb -= 8
    if tb >= max(8, max_tb // 4):
        return tb, b8
    # Only degenerate divisors: accept a little padding to keep tiles large.
    return max_tb, _round_up(b8, max_tb)


# --------------------------------------------------------------------------
# Wrapper
# --------------------------------------------------------------------------
def encoder_forward(x, packed, *, max_tile_rows=None, out_dtype=jnp.float32):
    """Returns (loc, |scale|), each [B, L] float32."""
    B, D = x.shape
    W1, B1, W2, B2 = packed["W1"], packed["B1"], packed["W2"], packed["B2"]
    H2 = W1.shape[1]                      # 2H
    OUT_PAD = packed["out_pad"]
    L = packed["L"]

    # Kernel reads x at the weights' dtype (bf16 halves the dominant HBM
    # stream; in production x should already be stored in this dtype).
    cdt = W1.dtype
    if x.dtype != cdt:
        x = x.astype(cdt)

    budget = _vmem_budget_bytes()
    if max_tile_rows is None:
        # Larger tiles on 128 MiB-VMEM parts (v5e/v6e), 512 on v7x (64 MiB).
        max_tile_rows = 1024 if budget >= (48 << 20) else 512

    TB, B_pad = _choose_batch_tiling(B, max_tile_rows)

    x_item = np.dtype(cdt).itemsize
    o_item = np.dtype(out_dtype).itemsize
    w_bytes = 2 * (W1.size * W1.dtype.itemsize + B1.size * B1.dtype.itemsize +
                   W2.size * W2.dtype.itemsize + B2.size * B2.dtype.itemsize)

    def tile_bytes(tb):
        # double-buffered x / out tiles + (double-buffered) resident weights
        return 2 * tb * D * x_item + 2 * tb * OUT_PAD * o_item + w_bytes

    # Shrink TB if a wide observed_dim would blow the VMEM budget.
    while TB > 8 and tile_bytes(TB) > budget:
        TB = max(8, _round_up(TB // 2, 8))
    if B_pad % TB:
        B_pad = _round_up(B_pad, TB)

    if B_pad != B:
        x = jnp.pad(x, ((0, B_pad - B), (0, 0)))
    grid = (B_pad // TB,)

    kernel = functools.partial(_encoder_kernel, split_lane=L,
                               hidden=packed["H"],
                               split_heads=packed["split_heads"])

    vmem_limit = int(min(max(tile_bytes(TB) + (4 << 20), 16 << 20), 100 << 20))

    out = pl.pallas_call(
        kernel,
        out_shape=jax.ShapeDtypeStruct((B_pad, OUT_PAD), out_dtype),
        grid=grid,
        in_specs=[
            pl.BlockSpec((TB, D), lambda i: (i, 0)),        # x tile (pipelined)
            pl.BlockSpec((D, H2), lambda i: (0, 0)),        # W1 (VMEM-resident)
            pl.BlockSpec((1, H2), lambda i: (0, 0)),        # B1
            pl.BlockSpec(W2.shape, lambda i: (0, 0)),       # W2
            pl.BlockSpec((1, OUT_PAD), lambda i: (0, 0)),   # B2
        ],
        out_specs=pl.BlockSpec((TB, OUT_PAD), lambda i: (i, 0)),
        compiler_params=pltpu.CompilerParams(
            dimension_semantics=("parallel",),              # megacore on v7x
            vmem_limit_bytes=vmem_limit),
    )(x, W1, B1, W2, B2)

    scale_off = OUT_PAD // 2 if packed["split_heads"] else L
    loc = out[:B, :L].astype(jnp.float32)
    scale = out[:B, scale_off:scale_off + L].astype(jnp.float32)
    return loc, scale


# --------------------------------------------------------------------------
# Synthetic parameters + pure-JAX reference
# --------------------------------------------------------------------------
def init_params(key, observed_dim, hidden_dim, latent_dim, dtype=jnp.float32):
    """Deterministic synthetic parameters (weights stored [in, out])."""
    out_dim = latent_dim - 1  # Encoder.construct uses latent_dim - 1
    ks = jax.random.split(key, 8)
    s1 = 1.0 / jnp.sqrt(observed_dim)
    s2 = 1.0 / jnp.sqrt(hidden_dim)
    p = {
        "w1l": jax.random.normal(ks[0], (observed_dim, hidden_dim), jnp.float32) * s1,
        "b1l": jax.random.normal(ks[1], (1, hidden_dim), jnp.float32) * 0.01,
        "w2l": jax.random.normal(ks[2], (hidden_dim, out_dim), jnp.float32) * s2,
        "b2l": jax.random.normal(ks[3], (1, out_dim), jnp.float32) * 0.01,
        "w1s": jax.random.normal(ks[4], (observed_dim, hidden_dim), jnp.float32) * s1,
        "b1s": jax.random.normal(ks[5], (1, hidden_dim), jnp.float32) * 0.01,
        "w2s": jax.random.normal(ks[6], (hidden_dim, out_dim), jnp.float32) * s2,
        "b2s": jax.random.normal(ks[7], (1, out_dim), jnp.float32) * 0.01,
    }
    return {k: v.astype(dtype) for k, v in p.items()}


def encoder_ref(x, p):
    """Pure-JAX reference (mirrors the PyTorch forward)."""
    h_loc = jnp.maximum(x @ p["w1l"] + p["b1l"], 0.0)
    loc = h_loc @ p["w2l"] + p["b2l"]
    h_sc = jnp.maximum(x @ p["w1s"] + p["b1s"], 0.0)
    sc = h_sc @ p["w2s"] + p["b2s"]
    return loc, jnp.abs(sc)


if __name__ == "__main__":
    key = jax.random.PRNGKey(0)
    k_x, k_p, k_x2, k_p2 = jax.random.split(key, 4)

    D, H = 16, 32

    # --- Config A: fused-head path (2L <= 128), f32 params, tight tolerance.
    B, latent = 8, 9
    L = latent - 1
    x = jax.random.normal(k_x, (B, D), jnp.float32)
    raw = init_params(k_p, D, H, latent)
    packed = pack_encoder_params(raw)
    loc, scale = encoder_forward(x, packed)
    jax.block_until_ready((loc, scale))
    loc_r, scale_r = encoder_ref(x, raw)
    assert loc.shape == (B, L) and scale.shape == (B, L)
    assert jnp.allclose(loc, loc_r, atol=1e-5, rtol=1e-5)
    assert jnp.allclose(scale, scale_r, atol=1e-5, rtol=1e-5)
    assert bool(jnp.all(scale >= 0.0))

    # --- Config B: recommended perf config — bf16 params / x / output,
    #     batch 16 so the grid has 2 steps (both v7x TensorCores busy).
    Bb = 16
    xb = jax.random.normal(k_x2, (Bb, D), jnp.float32)
    packed_bf16 = pack_encoder_params(raw, dtype=jnp.bfloat16)
    loc_b, scale_b = encoder_forward(xb, packed_bf16, out_dtype=jnp.bfloat16)
    jax.block_until_ready((loc_b, scale_b))
    loc_br, scale_br = encoder_ref(xb, raw)
    assert loc_b.shape == (Bb, L) and scale_b.shape == (Bb, L)
    assert jnp.allclose(loc_b, loc_br, atol=5e-2, rtol=5e-2)
    assert jnp.allclose(scale_b, scale_br, atol=5e-2, rtol=5e-2)
    assert bool(jnp.all(scale_b >= 0.0))

    # --- Config C: split-head path (2L > 128: two dense matmuls), f32.
    latent3 = 97
    L3 = latent3 - 1
    raw3 = init_params(k_p2, D, H, latent3)
    packed3 = pack_encoder_params(raw3)
    loc3, scale3 = encoder_forward(x, packed3)
    jax.block_until_ready((loc3, scale3))
    loc3_r, scale3_r = encoder_ref(x, raw3)
    assert loc3.shape == (B, L3) and scale3.shape == (B, L3)
    assert jnp.allclose(loc3, loc3_r, atol=1e-5, rtol=1e-5)
    assert jnp.allclose(scale3, scale3_r, atol=1e-5, rtol=1e-5)
    assert bool(jnp.all(scale3 >= 0.0))

    print("KERNEL_OK")
</pallas_src>

<mosaic_0001>
module attributes {stable_mosaic.version = 11 : i64} {
  func.func @_encoder_kernel(%arg0: i32, %arg1: memref<8x16xf32, #tpu.memory_space<vmem>>, %arg2: memref<16x64xf32, #tpu.memory_space<vmem>>, %arg3: memref<1x64xf32, #tpu.memory_space<vmem>>, %arg4: memref<64x128xf32, #tpu.memory_space<vmem>>, %arg5: memref<1x128xf32, #tpu.memory_space<vmem>>, %arg6: memref<8x128xf32, #tpu.memory_space<vmem>>) attributes {dimension_semantics = [#tpu.dimension_semantics<parallel>], iteration_bounds = array<i64: 1>, scalar_prefetch = 0 : i64, scratch_operands = 0 : i64, tpu.core_type = #tpu.core_type<tc>, window_params = [{transform_indices = @transform_0, window_bounds = array<i64: 8, 16>}, {pipeline_mode = #tpu.pipeline_mode<synchronous>, transform_indices = @transform_1, window_bounds = array<i64: 16, 64>}, {pipeline_mode = #tpu.pipeline_mode<synchronous>, transform_indices = @transform_2, window_bounds = array<i64: 1, 64>}, {pipeline_mode = #tpu.pipeline_mode<synchronous>, transform_indices = @transform_3, window_bounds = array<i64: 64, 128>}, {pipeline_mode = #tpu.pipeline_mode<synchronous>, transform_indices = @transform_4, window_bounds = array<i64: 1, 128>}, {transform_indices = @transform_5, window_bounds = array<i64: 8, 128>}]} {
    %c0 = arith.constant 0 : index
    %c0_0 = arith.constant 0 : index
    %0 = vector.load %arg1[%c0, %c0_0] : memref<8x16xf32, #tpu.memory_space<vmem>>, vector<8x16xf32>
    %c0_1 = arith.constant 0 : index
    %c0_2 = arith.constant 0 : index
    %1 = vector.load %arg2[%c0_1, %c0_2] : memref<16x64xf32, #tpu.memory_space<vmem>>, vector<16x64xf32>
    %cst = arith.constant dense<0.000000e+00> : vector<8x64xf32>
    %2 = tpu.matmul %0, %1, %cst {dimension_numbers = #tpu.dot_dimension_numbers<[1], [0], [0], [1], [0, 0, 1, 1], [], []>} : vector<8x16xf32>, vector<16x64xf32>, vector<8x64xf32> -> vector<8x64xf32>
    %c0_3 = arith.constant 0 : index
    %c0_4 = arith.constant 0 : index
    %3 = vector.load %arg3[%c0_3, %c0_4] : memref<1x64xf32, #tpu.memory_space<vmem>>, vector<1x64xf32>
    %4 = vector.broadcast %3 : vector<1x64xf32> to vector<8x64xf32>
    %5 = arith.addf %2, %4 : vector<8x64xf32>
    %cst_5 = arith.constant 0.000000e+00 : f32
    %6 = vector.broadcast %cst_5 : f32 to vector<8x64xf32>
    %7 = arith.maximumf %5, %6 : vector<8x64xf32>
    %c0_6 = arith.constant 0 : index
    %c0_7 = arith.constant 0 : index
    %8 = vector.load %arg5[%c0_6, %c0_7] : memref<1x128xf32, #tpu.memory_space<vmem>>, vector<1x128xf32>
    %c0_8 = arith.constant 0 : index
    %c0_9 = arith.constant 0 : index
    %9 = vector.load %arg4[%c0_8, %c0_9] : memref<64x128xf32, #tpu.memory_space<vmem>>, vector<64x128xf32>
    %cst_10 = arith.constant dense<0.000000e+00> : vector<8x128xf32>
    %10 = tpu.matmul %7, %9, %cst_10 {dimension_numbers = #tpu.dot_dimension_numbers<[1], [0], [0], [1], [0, 0, 1, 1], [], []>} : vector<8x64xf32>, vector<64x128xf32>, vector<8x128xf32> -> vector<8x128xf32>
    %11 = vector.broadcast %8 : vector<1x128xf32> to vector<8x128xf32>
    %12 = arith.addf %10, %11 : vector<8x128xf32>
    %13 = tpu.iota {dimensions = array<i32: 1>} : vector<8x128xi32>
    %c8_i32 = arith.constant 8 : i32
    %14 = vector.broadcast %c8_i32 : i32 to vector<8x128xi32>
    %15 = arith.cmpi sge, %13, %14 : vector<8x128xi32>
    %16 = math.absf %12 : vector<8x128xf32>
    %17 = arith.select %15, %16, %12 : vector<8x128xi1>, vector<8x128xf32>
    %c0_11 = arith.constant 0 : index
    %c0_12 = arith.constant 0 : index
    %18 = vector.load %arg6[%c0_11, %c0_12] : memref<8x128xf32, #tpu.memory_space<vmem>>, vector<8x128xf32>
    tpu.vector_store %arg6[%c0_11, %c0_12], %17 {strides = array<i32>} : memref<8x128xf32, #tpu.memory_space<vmem>>, vector<8x128xf32>,
    return
  }
  func.func @transform_0(%arg0: i32) -> (i32, i32) {
    %c0_i32 = arith.constant 0 : i32
    %c0_i32_0 = arith.constant 0 : i32
    return %arg0, %c0_i32 : i32, i32
  }
  func.func @transform_1(%arg0: i32) -> (i32, i32) {
    %c0_i32 = arith.constant 0 : i32
    %c0_i32_0 = arith.constant 0 : i32
    %c0_i32_1 = arith.constant 0 : i32
    return %c0_i32, %c0_i32_0 : i32, i32
  }
  func.func @transform_2(%arg0: i32) -> (i32, i32) {
    %c0_i32 = arith.constant 0 : i32
    %c0_i32_0 = arith.constant 0 : i32
    %c0_i32_1 = arith.constant 0 : i32
    return %c0_i32, %c0_i32_0 : i32, i32
  }
  func.func @transform_3(%arg0: i32) -> (i32, i32) {
    %c0_i32 = arith.constant 0 : i32
    %c0_i32_0 = arith.constant 0 : i32
    %c0_i32_1 = arith.constant 0 : i32
    return %c0_i32, %c0_i32_0 : i32, i32
  }
  func.func @transform_4(%arg0: i32) -> (i32, i32) {
    %c0_i32 = arith.constant 0 : i32
    %c0_i32_0 = arith.constant 0 : i32
    %c0_i32_1 = arith.constant 0 : i32
    return %c0_i32, %c0_i32_0 : i32, i32
  }
  func.func @transform_5(%arg0: i32) -> (i32, i32) {
    %c0_i32 = arith.constant 0 : i32
    %c0_i32_0 = arith.constant 0 : i32
    return %arg0, %c0_i32 : i32, i32
  }
}

</mosaic_0001>

<bundles_post_ra>
// kernel: tpu_custom_call.1
= control target key start
LH: loop header
LB: loop body
LE: loop exit
PB: predicated region body
PF: predicated region fallthrough
CT: control target
= control target key end

     0   :  { %10 = vsyncpa [#allocation3], 0  ;;  %s515_s0 = inlined_call_operand.hbm [shape: f32[8,16], index: 0, kind: input, shape index: {}]   ;;  %s516_s1 = inlined_call_operand.hbm [shape: f32[16,64], index: 1, kind: input, shape index: {}]   ;;  %s517_s2 = inlined_call_operand.vmem [shape: f32[1,64], index: 2, kind: input, shape index: {}]   ;;  %s518_s3 = inlined_call_operand.hbm [shape: f32[64,128], index: 3, kind: input, shape index: {}]   ;;  %s519_s4 = inlined_call_operand.vmem [shape: f32[1,128], index: 4, kind: input, shape index: {}]   ;;  %s520_s5 = inlined_call_operand.hbm [shape: f32[8,128], index: 5, kind: output, shape index: {}]  }
   0x1   :  { %11 = vsyncpa [#allocation6], 0 }
   0x2   :  { %12 = vsyncpa [#allocation4], 0  ;;  %s416_s18 = smov [#allocation5]   ;;  %s322_s22 = scalar_lea.hbm %s516_s1, 256 }
   0x3   :  { %s28_s19 = sshll.u32 %s416_s18, 4  ;;  %p323_p0 = scmp.ne.s32.totalorder %s516_s1, %s322_s22  ;;  %s29_s19 = int_to_ptr.vmem [resolvable:$true] %s28_s19 }
   0x4   :  { %p326_p1 = scmp.lt.u32.totalorder %s322_s22, %s516_s1 }
   0x6   :  { %p328_p2 = pnand %p326_p1, %p323_p0 }
   0x8   :  { %331 = shalt.err (!%p328_p2)
}
   0x9   :  { %s332_s27 = scalar_lea.vmem %s29_s19, 256  ;;  %p337_p4 = scmp.lt.s32.totalorder %s29_s19, %s29_s19 }
   0xa   :  { %p333_p3 = scmp.ne.s32.totalorder %s29_s19, %s332_s27  ;;  %p338_p5 = scmp.lt.s32.totalorder %s332_s27, %s332_s27 }
   0xc   :  { %p339_p6 = por %p338_p5, %p337_p4 }
   0xe   :  { %p340_p7 = pnand %p339_p6, %p333_p3 }
  0x10   :  { %343 = shalt.err (!%p340_p7)
}
  0x11   :  { %s417_s28 = smov 128   ;;  %s418_s29 = smov 8  }
  0x12   :  { %34 = dma.hbm_to_vmem [thread:$0]  %s516_s1, 256, %s29_s19, [#allocation6], %s417_s28, %s417_s28, %s418_s29  }
  0x13   :  { %s419_s7 = smov [#allocation2]   ;;  %s420_s9 = smov [#allocation7]  }
  0x14   :  { %s19_s8 = sshll.u32 %s419_s7, 4  ;;  %s42_s10 = sshll.u32 %s420_s9, 4  ;;  %s20_s8 = int_to_ptr.vmem [resolvable:$true] %s19_s8  ;;  %s43_s10 = int_to_ptr.vmem [resolvable:$true] %s42_s10 }
  0x15   :  { %s344_s13 = scalar_lea.hbm %s515_s0, 128 }
  0x16   :  { %p345_p8 = scmp.ne.s32.totalorder %s515_s0, %s344_s13  ;;  %p348_p9 = scmp.lt.u32.totalorder %s344_s13, %s515_s0 }
  0x18   :  { %p350_p10 = pnand %p348_p9, %p345_p8 }
  0x1a   :  { %353 = shalt.err (!%p350_p10)
}
  0x1b   :  { %s354_s1 = scalar_lea.vmem %s20_s8, 128  ;;  %p359_p12 = scmp.lt.s32.totalorder %s20_s8, %s20_s8 }
  0x1c   :  { %p355_p11 = scmp.ne.s32.totalorder %s20_s8, %s354_s1  ;;  %p360_p13 = scmp.lt.s32.totalorder %s354_s1, %s354_s1 }
  0x1e   :  { %p361_p0 = por %p360_p13, %p359_p12 }
  0x20   :  { %p362_p1 = pnand %p361_p0, %p355_p11 }
  0x22   :  { %365 = shalt.err (!%p362_p1)
}
  0x23   :  { %22 = dma.hbm_to_vmem [thread:$0]  %s515_s0, 128, %s20_s8, [#allocation3]  }
  0x24   :  { %s366_s22 = scalar_lea.hbm %s518_s3, 1024 }
  0x25   :  { %p367_p2 = scmp.ne.s32.totalorder %s518_s3, %s366_s22  ;;  %p370_p3 = scmp.lt.u32.totalorder %s366_s22, %s518_s3 }
  0x27   :  { %p372_p4 = pnand %p370_p3, %p367_p2 }
  0x29   :  { %375 = shalt.err (!%p372_p4)
}
  0x2a   :  { %s376_s27 = scalar_lea.vmem %s43_s10, 1024  ;;  %p381_p6 = scmp.lt.s32.totalorder %s43_s10, %s43_s10 }
  0x2b   :  { %p377_p5 = scmp.ne.s32.totalorder %s43_s10, %s376_s27  ;;  %p382_p7 = scmp.lt.s32.totalorder %s376_s27, %s376_s27 }
  0x2d   :  { %p383_p8 = por %p382_p7, %p381_p6 }
  0x2f   :  { %p384_p9 = pnand %p383_p8, %p377_p5 }
  0x31   :  { %387 = shalt.err (!%p384_p9)
}
  0x32   :  { %48 = dma.hbm_to_vmem [thread:$0]  %s518_s3, 1024, %s43_s10, [#allocation6], %s417_s28, %s417_s28, %s418_s29  }
  0x33   :  { %410 = dma.done.wait [#allocation3], 128  }
  0x34   :  { %411 = vsyncadd [#allocation3], 4294967168 }
  0x35   :  { %412 = dma.done.wait [#allocation6], 1280  }
  0x36   :  { %413 = vsyncadd [#allocation6], 4294966016  ;;  %v421_v0 = vmov 0.0|0.0   ;;  %vm422_vm0 = vmmov 0   ;;  %v423_v1 = vmov 0.0   ;;  %v61_v2 = vld [vmem:[#allocation5] sm:$0xff]  ;;  %v234_v23 = vlaneseq }
  0x37   :  { %298 = vmatprep.subr.bf16.mxu0 %v421_v0  ;;  %276 = vmatprep.mubr.msk.f32.mxu0 %vm422_vm0, %v423_v1  ;;  %v62_v3 = vld [vmem:[#allocation5 + $0x8] sm:$0xff]  ;;  %v146_v5 = vld [vmem:[#allocation7] sm:$0xff]  ;;  %v147_v6 = vld [vmem:[#allocation7 + $0x8] sm:$0xff]  ;;  %vm70_vm1 = vcmask 130048   ;;  %vm160_vm2 = vcmask 523264   ;;  %s424_s7 = smov [#allocation8]  }
  0x38   :  { %301 = vmatprep.subr.bf16.mxu1 %v421_v0  ;;  %295 = vmatprep.mubr.msk.f32.mxu1 %vm422_vm0, %v423_v1  ;;  %v299_v4 = vpack.c.bf16 %v62_v3, %v61_v2  ;;  %v148_v7 = vld [vmem:[#allocation7 + $0x10] sm:$0xff]  ;;  %v302_v8 = vpack.c.bf16 %v147_v6, %v146_v5  ;;  %v149_v9 = vld [vmem:[#allocation7 + $0x18] sm:$0xff]  ;;  %v60_v10 = vld [vmem:[#allocation2] sm:$0xff]  ;;  %v235_v25 = vand.u32 127, %v234_v23  ;;  %s246_s8 = sshll.u32 %s424_s7, 4  ;;  %s247_s8 = int_to_ptr.vmem [resolvable:$true] %s246_s8 }
  0x39   :  { %v305_v11 = vpack.c.bf16 %v149_v9, %v148_v7  ;;  %v150_v12 = vld [vmem:[#allocation7 + $0x20] sm:$0xff]  ;;  %v151_v13 = vld [vmem:[#allocation7 + $0x28] sm:$0xff]  ;;  %v152_v15 = vld [vmem:[#allocation7 + $0x30] sm:$0xff]  ;;  %p393_p11 = scmp.lt.s32.totalorder %s247_s8, %s247_s8 }
  0x3a   :  { %300 = vmatpush3.bf16.msra.mxu0 %v299_v4  ;;  %303 = vmatpush3.bf16.msra.mxu1 %v302_v8  ;;  %v308_v14 = vpack.c.bf16 %v151_v13, %v150_v12  ;;  %v153_v16 = vld [vmem:[#allocation7 + $0x38] sm:$0xff]  ;;  %v256_v18 = vld [vmem:[%s517_s2] ss:$0 sm:$0xff]  ;;  %vm236_vm3 = vcmp.ge.s32.totalorder %v235_v25, 8  ;;  %s388_s2 = scalar_lea.vmem %s247_s8, 128 }
  0x3b   :  { %304 = vmatprep.subr.bf16.mxu1 %v421_v0  ;;  %v311_v17 = vpack.c.bf16 %v153_v16, %v152_v15  ;;  %v258_v24 = vld [vmem:[%s519_s4] ss:$0 sm:$0xff]  ;;  %p389_p10 = scmp.ne.s32.totalorder %s247_s8, %s388_s2  ;;  %p394_p12 = scmp.lt.s32.totalorder %s388_s2, %s388_s2 }
  0x3d   :  { %277 = vmatmul.mubr.msk.f32.vlgmr.msra.gmra.mrb[0].mxu0 %vm70_vm1, %v60_v10  ;;  %p395_p13 = por %p394_p12, %p393_p11 }
  0x3e   :  { %306 = vmatpush3.bf16.msra.mxu1 %v305_v11 }
  0x3f   :  { %307 = vmatprep.subr.bf16.mxu1 %v421_v0  ;;  %p396_p0 = pnand %p395_p13, %p389_p10 }
  0x42   :  { %309 = vmatpush3.bf16.msra.mxu1 %v308_v14 }
  0x43   :  { %310 = vmatprep.subr.bf16.mxu1 %v421_v0 }
  0x46   :  { %312 = vmatpush3.bf16.msra.mxu1 %v311_v17 }
 0x110   :  { %v140_v19 = vpop.f32.mrb[0].mxu0 }
 0x111   :  { %v141_v20 = vadd.f32 %v256_v18, %v140_v19  ;;  %v278_v21 = vpop.f32.mrb[1].mxu0 }
 0x113   :  { %v144_v22 = vmax.f32 %v141_v20, 0.0 }
 0x115   :  { %296 = vmatmul.mubr.msk.f32.vlgmr.msra.gmra.mrb[0].mxu1 %vm160_vm2, %v144_v22 }
 0x1e8   :  { %v230_v26 = vpop.f32.mrb[0].mxu1 }
 0x1e9   :  { %v231_v27 = vadd.f32 %v258_v24, %v230_v26  ;;  %v297_v28 = vpop.f32.mrb[1].mxu1 }
 0x1eb   :  { %v237_v29 = vand.u32 2147483647, %v231_v27 }
 0x1ed   :  { %v238_v30 = vsel %vm236_vm3, %v237_v29, %v231_v27 }
 0x1ee   :  { %239 = vst [vmem:[#allocation8] sm:$0xff] %v238_v30 }
 0x1ef   :  { %399 = shalt.err (!%p396_p0)
}
 0x1f0   :  { %s400_s10 = scalar_lea.hbm %s520_s5, 128 }
 0x1f1   :  { %p401_p1 = scmp.ne.s32.totalorder %s520_s5, %s400_s10  ;;  %p404_p2 = scmp.lt.u32.totalorder %s400_s10, %s520_s5 }
 0x1f3   :  { %p406_p3 = pnand %p404_p2, %p401_p1 }
 0x1f5   :  { %409 = shalt.err (!%p406_p3)
}
 0x1f6   :  { %249 = dma.vmem_to_hbm [thread:$0]  %s247_s8, 128, %s520_s5, [#allocation4]  }
 0x1f7   :  { %414 = dma.done.wait [#allocation4], 128  }
 0x1f8   :  { %415 = vsyncadd [#allocation4], 4294967168 }
 0x1f9   :  { %253 = vsyncpa [#allocation3], 1 }
 0x1fa   :  { %254 = vsyncpa [#allocation6], 1 }
 0x1fb   :  { %255 = vsyncpa [#allocation4], 1 }

</bundles_post_ra>
